<compile_context>
chip_gen: v7x
topology: tpu7x:2x2x1
jax: 0.10.0
libtpu: 0.0.40
codegen_flags: <defaults>
</compile_context>

<pallas_src>
import jax
import jax.numpy as jnp
from jax.experimental import pallas as pl
from jax.experimental.pallas import tpu as pltpu


# ---------------------------------------------------------------------------
# Kernels
# ---------------------------------------------------------------------------

def _matmul_kernel_f32_out(a_ref, b_ref, o_ref):
    """Grid=(M//tm, N//tn, K//tk).  Output block index ignores k, so o_ref is
    resident across the reduction axis -> accumulate into it directly."""
    @pl.when(pl.program_id(2) == 0)
    def _():
        o_ref[...] = jnp.zeros_like(o_ref)

    o_ref[...] += jnp.dot(
        a_ref[...], b_ref[...], preferred_element_type=jnp.float32
    )


def _matmul_kernel_acc(a_ref, b_ref, o_ref, acc_ref):
    """Same loop structure, but with an f32 scratch accumulator and a final
    cast for non-f32 output dtypes (e.g. bf16 inputs)."""
    @pl.when(pl.program_id(2) == 0)
    def _():
        acc_ref[...] = jnp.zeros_like(acc_ref)

    acc_ref[...] += jnp.dot(
        a_ref[...], b_ref[...], preferred_element_type=jnp.float32
    )

    @pl.when(pl.program_id(2) == pl.num_programs(2) - 1)
    def _():
        o_ref[...] = acc_ref[...].astype(o_ref.dtype)


def _matmul_kernel_single(a_ref, b_ref, o_ref):
    """Single-block kernel: whole (tiny) problem lives in VMEM, no grid."""
    o_ref[...] = jnp.dot(
        a_ref[...], b_ref[...], preferred_element_type=jnp.float32
    ).astype(o_ref.dtype)


# ---------------------------------------------------------------------------
# Helpers
# ---------------------------------------------------------------------------

_SINGLE_BLOCK_BYTES = 2 * 1024 * 1024   # tiny problems: one unpipelined block
_LANE = 128


def _round_up(x: int, m: int) -> int:
    return (x + m - 1) // m * m


def _physical_vmem_bytes() -> int:
    """Per-TensorCore VMEM capacity; conservative (64 MiB) if unknown."""
    try:
        info = pltpu.get_tpu_info()
        v = getattr(info, "vmem_capacity_bytes", None)
        if v:
            return int(v)
    except Exception:
        pass
    try:
        kind = jax.devices()[0].device_kind.lower()
        if "v7" in kind:
            return 64 << 20
        if "v5" in kind or "v6" in kind:
            return 128 << 20
    except Exception:
        pass
    return 64 << 20


def _choose_tile(dim: int, target: int):
    """Return (tile, padded_dim) with tile | padded_dim and padded_dim >= dim.

    If dim <= target, the whole (128-aligned) dim is one block.  Otherwise walk
    down from `target`, accepting the first tile whose padding waste is small
    (<= dim/4 or <= 256 elements); a 256 tile always qualifies for large dims,
    so tiles never degrade to 128 on big problems.
    """
    if dim <= target:
        p = _round_up(dim, _LANE)
        return p, p
    t = target
    while t > _LANE:
        p = _round_up(dim, t)
        waste = p - dim
        if waste * 4 <= dim or waste <= 256:
            return t, p
        t //= 2
    return _LANE, _round_up(dim, _LANE)


# ---------------------------------------------------------------------------
# Wrapper
# ---------------------------------------------------------------------------

def matmul(a: jax.Array, b: jax.Array) -> jax.Array:
    M, K = a.shape
    K2, N = b.shape
    assert K == K2, "inner dimensions must match"

    # TODO(synk): integer inputs accumulate in f32 (not exact integer matmul
    # semantics for very large K); the module's intended use is floating point.
    out_dtype = jnp.result_type(a.dtype, b.dtype)
    out_itemsize = jnp.dtype(out_dtype).itemsize
    a_bytes = a.size * a.dtype.itemsize
    b_bytes = b.size * b.dtype.itemsize
    out_bytes = M * N * out_itemsize

    # --- tiny problem: one invocation, no grid / pipeline overhead ----------
    if a_bytes + b_bytes + out_bytes <= _SINGLE_BLOCK_BYTES:
        cost = pl.CostEstimate(flops=2 * M * N * K, transcendentals=0,
                               bytes_accessed=a_bytes + b_bytes + out_bytes)
        return pl.pallas_call(
            _matmul_kernel_single,
            out_shape=jax.ShapeDtypeStruct((M, N), out_dtype),
            cost_estimate=cost,
        )(a, b)

    # --- generation-aware tile targets ---------------------------------------
    phys_vmem = _physical_vmem_bytes()
    in_itemsize = max(a.dtype.itemsize, b.dtype.itemsize)
    if phys_vmem <= (64 << 20):
        # v7x: 64 MiB VMEM / 3.2 TB/s HBM -> 1024 tiles already hit the
        # compute roofline; bigger tiles only burn VMEM.
        target_mn, target_k = 1024, 512
    elif in_itemsize <= 2:
        # v5e/v6e (128 MiB VMEM), bf16-class inputs: large tiles to reach
        # ~1024 FLOP/B (compute-bound vs ~1.4 TB/s HBM).
        target_mn, target_k = 2048, 1024
    else:
        # v5e/v6e, f32 inputs.
        target_mn, target_k = 1024, 512

    tm, M_p = _choose_tile(M, target_mn)
    tn, N_p = _choose_tile(N, target_mn)
    tk, K_p = _choose_tile(K, target_k)

    # Keep >=2 blocks along the parallel (i, j) axes so both TensorCores of a
    # dual-core chip (v7x) get work; cheap no-op effect on 1-TC chips.
    if (M_p // tm) * (N_p // tn) == 1:
        if tn >= 256 and (tn // 2) % _LANE == 0:
            tn //= 2
        elif tm >= 16 and (tm // 2) % 8 == 0:
            tm //= 2

    # --- pad to tile multiples (lane-dense output, bounded VMEM) ------------
    if (M_p, K_p) != (M, K):
        a = jnp.pad(a, ((0, M_p - M), (0, K_p - K)))
    if (K_p, N_p) != (K, N):
        b = jnp.pad(b, ((0, K_p - K), (0, N_p - N)))

    grid = (M_p // tm, N_p // tn, K_p // tk)

    if out_dtype == jnp.float32:
        kernel = _matmul_kernel_f32_out
        scratch_shapes = []
        acc_bytes = 0
    else:
        kernel = _matmul_kernel_acc
        scratch_shapes = [pltpu.VMEM((tm, tn), jnp.float32)]
        acc_bytes = tm * tn * 4

    # Double-buffered blocks + scratch accumulator.
    footprint = (2 * (tm * tk * a.dtype.itemsize
                      + tk * tn * b.dtype.itemsize
                      + tm * tn * out_itemsize)
                 + acc_bytes)
    vmem_limit = int(min(phys_vmem * 3 // 4,
                         max(32 << 20, footprint + (12 << 20))))

    cost = pl.CostEstimate(
        flops=2 * M_p * N_p * K_p,
        transcendentals=0,
        # A is re-read N_p/tn times, B re-read M_p/tm times, output written once.
        bytes_accessed=(M_p * K_p * a.dtype.itemsize * (N_p // tn)
                        + K_p * N_p * b.dtype.itemsize * (M_p // tm)
                        + M_p * N_p * out_itemsize),
    )

    out = pl.pallas_call(
        kernel,
        out_shape=jax.ShapeDtypeStruct((M_p, N_p), out_dtype),
        grid_spec=pltpu.PrefetchScalarGridSpec(
            num_scalar_prefetch=0,
            grid=grid,
            in_specs=[
                pl.BlockSpec((tm, tk), lambda i, j, k: (i, k)),
                pl.BlockSpec((tk, tn), lambda i, j, k: (k, j)),
            ],
            out_specs=pl.BlockSpec((tm, tn), lambda i, j, k: (i, j)),
            scratch_shapes=scratch_shapes,
        ),
        compiler_params=pltpu.CompilerParams(
            dimension_semantics=("parallel", "parallel", "arbitrary"),
            vmem_limit_bytes=vmem_limit,
        ),
        cost_estimate=cost,
    )(a, b)

    if (M_p, N_p) != (M, N):
        out = out[:M, :N]
    return out


# ---------------------------------------------------------------------------
# Demo / correctness check
# ---------------------------------------------------------------------------

if __name__ == "__main__":
    key = jax.random.PRNGKey(0)
    k_a, k_b, k_c, k_d, k_e, k_f, k_g, k_h = jax.random.split(key, 8)

    # 1) Small aligned shape -> single-block path.
    M, K, N = 256, 256, 256
    A = jax.random.normal(k_a, (M, K), dtype=jnp.float32)
    B = jax.random.normal(k_b, (K, N), dtype=jnp.float32)
    C = jax.block_until_ready(matmul(A, B))
    C_ref = jnp.matmul(A, B)
    assert C.shape == (M, N)
    assert jnp.allclose(C, C_ref, atol=1e-3, rtol=1e-3), \
        "single-block path mismatch vs reference"

    # 2) Larger aligned f32 shape -> tiled path with direct f32 accumulation.
    M2, K2, N2 = 1024, 1024, 1024
    A2 = jax.random.normal(k_c, (M2, K2), dtype=jnp.float32)
    B2 = jax.random.normal(k_d, (K2, N2), dtype=jnp.float32)
    C2 = jax.block_until_ready(matmul(A2, B2))
    C2_ref = jnp.matmul(A2, B2)
    assert C2.shape == (M2, N2)
    assert jnp.allclose(C2, C2_ref, atol=2e-2, rtol=2e-2), \
        "tiled f32 path mismatch vs reference"

    # 3) Non-aligned shape -> padding path (and output slice-back).
    M3, K3, N3 = 640, 1000, 250
    A3 = jax.random.normal(k_e, (M3, K3), dtype=jnp.float32)
    B3 = jax.random.normal(k_f, (K3, N3), dtype=jnp.float32)
    C3 = jax.block_until_ready(matmul(A3, B3))
    C3_ref = jnp.matmul(A3, B3)
    assert C3.shape == (M3, N3)
    assert jnp.allclose(C3, C3_ref, atol=2e-2, rtol=2e-2), \
        "padded path mismatch vs reference"

    # 4) bf16 inputs -> tiled path with f32 scratch accumulator + cast.
    M4, K4, N4 = 512, 1024, 512
    A4 = jax.random.normal(k_g, (M4, K4), dtype=jnp.float32).astype(jnp.bfloat16)
    B4 = jax.random.normal(k_h, (K4, N4), dtype=jnp.float32).astype(jnp.bfloat16)
    C4 = jax.block_until_ready(matmul(A4, B4))
    C4_ref = jnp.matmul(A4.astype(jnp.float32), B4.astype(jnp.float32))
    assert C4.shape == (M4, N4)
    assert jnp.allclose(C4.astype(jnp.float32), C4_ref, atol=1e-1, rtol=2e-2), \
        "bf16 accumulator path mismatch vs reference"

    print("KERNEL_OK")
</pallas_src>

<mosaic_0001>
module attributes {stable_mosaic.version = 11 : i64} {
  func.func @_matmul_kernel_single(%arg0: memref<256x256xf32, #tpu.memory_space<vmem>>, %arg1: memref<256x256xf32, #tpu.memory_space<vmem>>, %arg2: memref<256x256xf32, #tpu.memory_space<vmem>>) attributes {dimension_semantics = [], scalar_prefetch = 0 : i64, scratch_operands = 0 : i64, tpu.core_type = #tpu.core_type<tc>} {
    %c0 = arith.constant 0 : index
    %c0_0 = arith.constant 0 : index
    %0 = vector.load %arg0[%c0, %c0_0] : memref<256x256xf32, #tpu.memory_space<vmem>>, vector<256x256xf32>
    %c0_1 = arith.constant 0 : index
    %c0_2 = arith.constant 0 : index
    %1 = vector.load %arg1[%c0_1, %c0_2] : memref<256x256xf32, #tpu.memory_space<vmem>>, vector<256x256xf32>
    %cst = arith.constant dense<0.000000e+00> : vector<256x256xf32>
    %2 = tpu.matmul %0, %1, %cst {dimension_numbers = #tpu.dot_dimension_numbers<[1], [0], [0], [1], [0, 0, 1, 1], [], []>} : vector<256x256xf32>, vector<256x256xf32>, vector<256x256xf32> -> vector<256x256xf32>
    %c0_3 = arith.constant 0 : index
    %c0_4 = arith.constant 0 : index
    %3 = vector.load %arg2[%c0_3, %c0_4] : memref<256x256xf32, #tpu.memory_space<vmem>>, vector<256x256xf32>
    tpu.vector_store %arg2[%c0_3, %c0_4], %2 {strides = array<i32>} : memref<256x256xf32, #tpu.memory_space<vmem>>, vector<256x256xf32>,
    return
  }
}

</mosaic_0001>

<bundles_post_ra>
// kernel: tpu_custom_call.1
= control target key start
LH: loop header
LB: loop body
LE: loop exit
PB: predicated region body
PF: predicated region fallthrough
CT: control target
= control target key end

     0   :  { %7 = vsyncpa [#allocation3], 0  ;;  %s745_s0 = inlined_call_operand.hbm [shape: f32[256,256], index: 0, kind: input, shape index: {}]   ;;  %s746_s1 = inlined_call_operand.hbm [shape: f32[256,256], index: 1, kind: input, shape index: {}]   ;;  %s747_s2 = inlined_call_operand.hbm [shape: f32[256,256], index: 2, kind: output, shape index: {}]  }
   0x1   :  { %8 = vsyncpa [#allocation6], 0 }
   0x2   :  { %9 = vsyncpa [#allocation4], 0  ;;  %s680_s9 = smov [#allocation2]   ;;  %s608_s13 = scalar_lea.hbm %s745_s0, 8192 }
   0x3   :  { %s15_s10 = sshll.u32 %s680_s9, 4  ;;  %p609_p0 = scmp.ne.s32.totalorder %s745_s0, %s608_s13  ;;  %s16_s10 = int_to_ptr.vmem [resolvable:$true] %s15_s10 }
   0x4   :  { %p612_p1 = scmp.lt.u32.totalorder %s608_s13, %s745_s0 }
   0x6   :  { %p614_p2 = pnand %p612_p1, %p609_p0 }
   0x8   :  { %617 = shalt.err (!%p614_p2)
}
   0x9   :  { %s618_s18 = scalar_lea.vmem %s16_s10, 8192  ;;  %p623_p4 = scmp.lt.s32.totalorder %s16_s10, %s16_s10 }
   0xa   :  { %p619_p3 = scmp.ne.s32.totalorder %s16_s10, %s618_s18  ;;  %p624_p5 = scmp.lt.s32.totalorder %s618_s18, %s618_s18 }
   0xc   :  { %p625_p6 = por %p624_p5, %p623_p4 }
   0xe   :  { %p626_p7 = pnand %p625_p6, %p619_p3 }
  0x10   :  { %629 = shalt.err (!%p626_p7)
}
  0x11   :  { %s681_s19 = smov 256   ;;  %s682_s20 = smov 16  }
  0x12   :  { %21 = dma.hbm_to_vmem [thread:$0]  %s745_s0, 8192, %s16_s10, [#allocation3], %s681_s19, %s681_s19, %s682_s20  }
  0x13   :  { %s683_s23 = smov [#allocation5]   ;;  %s630_s27 = scalar_lea.hbm %s746_s1, 8192 }
  0x14   :  { %s27_s24 = sshll.u32 %s683_s23, 4  ;;  %p631_p8 = scmp.ne.s32.totalorder %s746_s1, %s630_s27  ;;  %s28_s24 = int_to_ptr.vmem [resolvable:$true] %s27_s24 }
  0x15   :  { %p634_p9 = scmp.lt.u32.totalorder %s630_s27, %s746_s1 }
  0x17   :  { %p636_p10 = pnand %p634_p9, %p631_p8 }
  0x19   :  { %639 = shalt.err (!%p636_p10)
}
  0x1a   :  { %s640_s4 = scalar_lea.vmem %s28_s24, 8192  ;;  %p645_p12 = scmp.lt.s32.totalorder %s28_s24, %s28_s24 }
  0x1b   :  { %p641_p11 = scmp.ne.s32.totalorder %s28_s24, %s640_s4  ;;  %p646_p13 = scmp.lt.s32.totalorder %s640_s4, %s640_s4 }
  0x1d   :  { %p647_p0 = por %p646_p13, %p645_p12 }
  0x1f   :  { %p648_p1 = pnand %p647_p0, %p641_p11 }
  0x21   :  { %651 = shalt.err (!%p648_p1)
}
  0x22   :  { %33 = dma.hbm_to_vmem [thread:$0]  %s746_s1, 8192, %s28_s24, [#allocation6], %s681_s19, %s681_s19, %s682_s20  }
  0x23   :  { %674 = dma.done.wait [#allocation3], 8192  }
  0x24   :  { %675 = vsyncadd [#allocation3], 4294959104 }
  0x25   :  { %676 = dma.done.wait [#allocation6], 8192  }
  0x26   :  { %677 = vsyncadd [#allocation6], 4294959104  ;;  %v105_v0 = vld [vmem:[#allocation5 + $0x8] sm:$0xff]  ;;  %v107_v1 = vld [vmem:[#allocation5 + $0x18] sm:$0xff]  ;;  %s684_s1 = smov [#allocation7]  }
  0x27   :  { %v104_v2 = vld [vmem:[#allocation5] sm:$0xff]  ;;  %v507_v3 = vpack.c.bf16 %v107_v1, %v105_v0  ;;  %v106_v4 = vld [vmem:[#allocation5 + $0x10] sm:$0xff]  ;;  %v109_v5 = vld [vmem:[#allocation5 + $0x28] sm:$0xff]  ;;  %s494_s6 = sshll.u32 %s684_s1, 4  ;;  %s495_s6 = int_to_ptr.vmem [resolvable:$true] %s494_s6 }
  0x28   :  { %v111_v6 = vld [vmem:[#allocation5 + $0x38] sm:$0xff]  ;;  %v509_v7 = vpack.c.bf16 %v106_v4, %v104_v2  ;;  %v108_v9 = vld [vmem:[#allocation5 + $0x20] sm:$0xff]  ;;  %v110_v10 = vld [vmem:[#allocation5 + $0x30] sm:$0xff]  ;;  %s652_s7 = scalar_lea.vmem %s495_s6, 8192  ;;  %p657_p3 = scmp.lt.s32.totalorder %s495_s6, %s495_s6 }
  0x29   :  { %v511_v8 = vpack.c.bf16 %v111_v6, %v109_v5  ;;  %v113_v11 = vld [vmem:[#allocation5 + $0x48] sm:$0xff]  ;;  %508 = vmatprep.subr.bf16.mxu0 %v507_v3  ;;  %571 = vmatprep.subr.bf16.mxu1 %v507_v3  ;;  %v115_v12 = vld [vmem:[#allocation5 + $0x58] sm:$0xff]  ;;  %v513_v13 = vpack.c.bf16 %v110_v10, %v108_v9  ;;  %v112_v15 = vld [vmem:[#allocation5 + $0x40] sm:$0xff]  ;;  %p653_p2 = scmp.ne.s32.totalorder %s495_s6, %s652_s7  ;;  %p658_p4 = scmp.lt.s32.totalorder %s652_s7, %s652_s7 }
  0x2a   :  { %510 = vmatpush1.bf16.msra.mxu0 %v509_v7  ;;  %587 = vmatpush1.bf16.msra.mxu1 %v509_v7  ;;  %v515_v14 = vpack.c.bf16 %v115_v12, %v113_v11  ;;  %v114_v16 = vld [vmem:[#allocation5 + $0x50] sm:$0xff]  ;;  %v117_v17 = vld [vmem:[#allocation5 + $0x68] sm:$0xff]  ;;  %v119_v18 = vld [vmem:[#allocation5 + $0x78] sm:$0xff] }
  0x2b   :  { %512 = vmatprep.subr.bf16.mxu0 %v511_v8  ;;  %572 = vmatprep.subr.bf16.mxu1 %v511_v8  ;;  %v517_v19 = vpack.c.bf16 %v114_v16, %v112_v15  ;;  %v519_v20 = vpack.c.bf16 %v119_v18, %v117_v17  ;;  %v116_v21 = vld [vmem:[#allocation5 + $0x60] sm:$0xff]  ;;  %v118_v22 = vld [vmem:[#allocation5 + $0x70] sm:$0xff]  ;;  %v121_v23 = vld [vmem:[#allocation5 + $0x88] sm:$0xff]  ;;  %p659_p5 = por %p658_p4, %p657_p3 }
  0x2c   :  { %v123_v24 = vld [vmem:[#allocation5 + $0x98] sm:$0xff]  ;;  %v521_v25 = vpack.c.bf16 %v118_v22, %v116_v21  ;;  %v120_v27 = vld [vmem:[#allocation5 + $0x80] sm:$0xff]  ;;  %v122_v28 = vld [vmem:[#allocation5 + $0x90] sm:$0xff] }
  0x2d   :  { %v523_v26 = vpack.c.bf16 %v123_v24, %v121_v23  ;;  %v125_v29 = vld [vmem:[#allocation5 + $0xa8] sm:$0xff]  ;;  %v127_v30 = vld [vmem:[#allocation5 + $0xb8] sm:$0xff]  ;;  %v525_v31 = vpack.c.bf16 %v122_v28, %v120_v27  ;;  %v124_v33 = vld [vmem:[#allocation5 + $0xa0] sm:$0xff]  ;;  %p660_p6 = pnand %p659_p5, %p653_p2 }
  0x2e   :  { %514 = vmatpush1.bf16.msra.mxu0 %v513_v13  ;;  %588 = vmatpush1.bf16.msra.mxu1 %v513_v13  ;;  %v527_v32 = vpack.c.bf16 %v127_v30, %v125_v29  ;;  %v126_v34 = vld [vmem:[#allocation5 + $0xb0] sm:$0xff]  ;;  %v129_v35 = vld [vmem:[#allocation5 + $0xc8] sm:$0xff]  ;;  %v131_v36 = vld [vmem:[#allocation5 + $0xd8] sm:$0xff] }
  0x2f   :  { %516 = vmatprep.subr.bf16.mxu0 %v515_v14  ;;  %573 = vmatprep.subr.bf16.mxu1 %v515_v14  ;;  %v529_v37 = vpack.c.bf16 %v126_v34, %v124_v33  ;;  %v128_v38 = vld [vmem:[#allocation5 + $0xc0] sm:$0xff]  ;;  %v531_v39 = vpack.c.bf16 %v131_v36, %v129_v35  ;;  %v130_v40 = vld [vmem:[#allocation5 + $0xd0] sm:$0xff]  ;;  %v41_v41 = vld [vmem:[#allocation2 + $0x8] sm:$0xff] }
  0x30   :  { %v73_v42 = vld [vmem:[#allocation2 + $0x108] sm:$0xff]  ;;  %v135_v44 = vld [vmem:[#allocation5 + $0xf8] sm:$0xff]  ;;  %232 = vmatprep.mubr.f32.mxu0 %v41_v41  ;;  %v533_v45 = vpack.c.bf16 %v130_v40, %v128_v38  ;;  %v132_v47 = vld [vmem:[#allocation5 + $0xe0] sm:$0xff] }
  0x31   :  { %v133_v43 = vld [vmem:[#allocation5 + $0xe8] sm:$0xff]  ;;  %328 = vmatprep.mubr.f32.mxu1 %v73_v42  ;;  %v134_v48 = vld [vmem:[#allocation5 + $0xf0] sm:$0xff]  ;;  %v139_v50 = vld [vmem:[#allocation5 + $0x118] sm:$0xff] }
  0x32   :  { %518 = vmatpush1.bf16.msra.mxu0 %v517_v19  ;;  %589 = vmatpush1.bf16.msra.mxu1 %v517_v19  ;;  %v535_v46 = vpack.c.bf16 %v135_v44, %v133_v43  ;;  %v137_v49 = vld [vmem:[#allocation5 + $0x108] sm:$0xff]  ;;  %v537_v51 = vpack.c.bf16 %v134_v48, %v132_v47  ;;  %v136_v53 = vld [vmem:[#allocation5 + $0x100] sm:$0xff]  ;;  %v138_v54 = vld [vmem:[#allocation5 + $0x110] sm:$0xff] }
  0x33   :  { %520 = vmatprep.subr.bf16.mxu0 %v519_v20  ;;  %574 = vmatprep.subr.bf16.mxu1 %v519_v20  ;;  %v539_v52 = vpack.c.bf16 %v139_v50, %v137_v49  ;;  %v141_v55 = vld [vmem:[#allocation5 + $0x128] sm:$0xff]  ;;  %v143_v56 = vld [vmem:[#allocation5 + $0x138] sm:$0xff]  ;;  %v541_v57 = vpack.c.bf16 %v138_v54, %v136_v53  ;;  %v140_v59 = vld [vmem:[#allocation5 + $0x120] sm:$0xff] }
  0x34   :  { %v543_v58 = vpack.c.bf16 %v143_v56, %v141_v55  ;;  %v142_v60 = vld [vmem:[#allocation5 + $0x130] sm:$0xff]  ;;  %v145_v61 = vld [vmem:[#allocation5 + $0x148] sm:$0xff]  ;;  %v147_v62 = vld [vmem:[#allocation5 + $0x158] sm:$0xff] }
  0x35   :  { %v545_v63 = vpack.c.bf16 %v142_v60, %v140_v59  ;;  %v547_v0 = vpack.c.bf16 %v147_v62, %v145_v61  ;;  %v144_v1 = vld [vmem:[#allocation5 + $0x140] sm:$0xff]  ;;  %v146_v2 = vld [vmem:[#allocation5 + $0x150] sm:$0xff]  ;;  %v149_v3 = vld [vmem:[#allocation5 + $0x168] sm:$0xff] }
  0x36   :  { %522 = vmatpush1.bf16.msra.mxu0 %v521_v25  ;;  %590 = vmatpush1.bf16.msra.mxu1 %v521_v25  ;;  %v151_v4 = vld [vmem:[#allocation5 + $0x178] sm:$0xff]  ;;  %v549_v5 = vpack.c.bf16 %v146_v2, %v144_v1  ;;  %v148_v7 = vld [vmem:[#allocation5 + $0x160] sm:$0xff]  ;;  %v150_v8 = vld [vmem:[#allocation5 + $0x170] sm:$0xff] }
  0x37   :  { %524 = vmatprep.subr.bf16.mxu0 %v523_v26  ;;  %575 = vmatprep.subr.bf16.mxu1 %v523_v26  ;;  %v551_v6 = vpack.c.bf16 %v151_v4, %v149_v3  ;;  %v153_v9 = vld [vmem:[#allocation5 + $0x188] sm:$0xff]  ;;  %v155_v10 = vld [vmem:[#allocation5 + $0x198] sm:$0xff]  ;;  %v553_v11 = vpack.c.bf16 %v150_v8, %v148_v7  ;;  %v152_v13 = vld [vmem:[#allocation5 + $0x180] sm:$0xff] }
  0x38   :  { %v555_v12 = vpack.c.bf16 %v155_v10, %v153_v9  ;;  %v154_v14 = vld [vmem:[#allocation5 + $0x190] sm:$0xff]  ;;  %v157_v15 = vld [vmem:[#allocation5 + $0x1a8] sm:$0xff]  ;;  %v159_v16 = vld [vmem:[#allocation5 + $0x1b8] sm:$0xff] }
  0x39   :  { %v557_v17 = vpack.c.bf16 %v154_v14, %v152_v13  ;;  %v559_v18 = vpack.c.bf16 %v159_v16, %v157_v15  ;;  %v156_v19 = vld [vmem:[#allocation5 + $0x1a0] sm:$0xff]  ;;  %v158_v20 = vld [vmem:[#allocation5 + $0x1b0] sm:$0xff]  ;;  %v161_v21 = vld [vmem:[#allocation5 + $0x1c8] sm:$0xff] }
  0x3a   :  { %526 = vmatpush1.bf16.msra.mxu0 %v525_v31  ;;  %591 = vmatpush1.bf16.msra.mxu1 %v525_v31  ;;  %v163_v22 = vld [vmem:[#allocation5 + $0x1d8] sm:$0xff]  ;;  %v561_v23 = vpack.c.bf16 %v158_v20, %v156_v19  ;;  %v160_v25 = vld [vmem:[#allocation5 + $0x1c0] sm:$0xff]  ;;  %v162_v26 = vld [vmem:[#allocation5 + $0x1d0] sm:$0xff] }
  0x3b   :  { %528 = vmatprep.subr.bf16.mxu0 %v527_v32  ;;  %576 = vmatprep.subr.bf16.mxu1 %v527_v32  ;;  %v563_v24 = vpack.c.bf16 %v163_v22, %v161_v21  ;;  %v165_v27 = vld [vmem:[#allocation5 + $0x1e8] sm:$0xff]  ;;  %v167_v28 = vld [vmem:[#allocation5 + $0x1f8] sm:$0xff]  ;;  %v565_v29 = vpack.c.bf16 %v162_v26, %v160_v25  ;;  %v164_v31 = vld [vmem:[#allocation5 + $0x1e0] sm:$0xff] }
  0x3c   :  { %v567_v30 = vpack.c.bf16 %v167_v28, %v165_v27  ;;  %v166_v32 = vld [vmem:[#allocation5 + $0x1f0] sm:$0xff]  ;;  %v40_v34 = vld [vmem:[#allocation2] sm:$0xff]  ;;  %v43_v36 = vld [vmem:[#allocation2 + $0x18] sm:$0xff] }
  0x3d   :  { %v569_v33 = vpack.c.bf16 %v166_v32, %v164_v31  ;;  %v72_v35 = vld [vmem:[#allocation2 + $0x100] sm:$0xff]  ;;  %v42_v38 = vld [vmem:[#allocation2 + $0x10] sm:$0xff]  ;;  %v45_v40 = vld [vmem:[#allocation2 + $0x28] sm:$0xff] }
  0x3e   :  { %530 = vmatpush1.bf16.msra.mxu0 %v529_v37  ;;  %592 = vmatpush1.bf16.msra.mxu1 %v529_v37  ;;  %v75_v37 = vld [vmem:[#allocation2 + $0x118] sm:$0xff]  ;;  %v77_v41 = vld [vmem:[#allocation2 + $0x128] sm:$0xff]  ;;  %v44_v42 = vld [vmem:[#allocation2 + $0x20] sm:$0xff] }
  0x3f   :  { %532 = vmatprep.subr.bf16.mxu0 %v531_v39  ;;  %577 = vmatprep.subr.bf16.mxu1 %v531_v39  ;;  %v74_v39 = vld [vmem:[#allocation2 + $0x110] sm:$0xff]  ;;  %v76_v43 = vld [vmem:[#allocation2 + $0x120] sm:$0xff]  ;;  %v47_v44 = vld [vmem:[#allocation2 + $0x38] sm:$0xff] }
  0x40   :  { %v78_v47 = vld [vmem:[#allocation2 + $0x130] sm:$0xff]  ;;  %v49_v48 = vld [vmem:[#allocation2 + $0x48] sm:$0xff]  ;;  %v48_v50 = vld [vmem:[#allocation2 + $0x40] sm:$0xff] }
  0x41   :  { %v81_v49 = vld [vmem:[#allocation2 + $0x148] sm:$0xff]  ;;  %v83_v53 = vld [vmem:[#allocation2 + $0x158] sm:$0xff]  ;;  %v50_v54 = vld [vmem:[#allocation2 + $0x50] sm:$0xff] }
  0x42   :  { %534 = vmatpush1.bf16.msra.mxu0 %v533_v45  ;;  %593 = vmatpush1.bf16.msra.mxu1 %v533_v45  ;;  %v79_v45 = vld [vmem:[#allocation2 + $0x138] sm:$0xff]  ;;  %v82_v55 = vld [vmem:[#allocation2 + $0x150] sm:$0xff]  ;;  %v53_v56 = vld [vmem:[#allocation2 + $0x68] sm:$0xff] }
  0x43   :  { %536 = vmatprep.subr.bf16.mxu0 %v535_v46  ;;  %578 = vmatprep.subr.bf16.mxu1 %v535_v46  ;;  %v46_v46 = vld [vmem:[#allocation2 + $0x30] sm:$0xff]  ;;  %v84_v59 = vld [vmem:[#allocation2 + $0x160] sm:$0xff]  ;;  %v55_v60 = vld [vmem:[#allocation2 + $0x78] sm:$0xff] }
  0x44   :  { %v87_v61 = vld [vmem:[#allocation2 + $0x178] sm:$0xff]  ;;  %v54_v62 = vld [vmem:[#allocation2 + $0x70] sm:$0xff]  ;;  %v89_v1 = vld [vmem:[#allocation2 + $0x188] sm:$0xff] }
  0x45   :  { %v56_v2 = vld [vmem:[#allocation2 + $0x80] sm:$0xff]  ;;  %v59_v4 = vld [vmem:[#allocation2 + $0x98] sm:$0xff]  ;;  %v90_v7 = vld [vmem:[#allocation2 + $0x190] sm:$0xff] }
  0x46   :  { %538 = vmatpush1.bf16.msra.mxu0 %v537_v51  ;;  %594 = vmatpush1.bf16.msra.mxu1 %v537_v51  ;;  %v80_v51 = vld [vmem:[#allocation2 + $0x140] sm:$0xff]  ;;  %v61_v8 = vld [vmem:[#allocation2 + $0xa8] sm:$0xff]  ;;  %v95_v13 = vld [vmem:[#allocation2 + $0x1b8] sm:$0xff] }
  0x47   :  { %540 = vmatprep.subr.bf16.mxu0 %v539_v52  ;;  %579 = vmatprep.subr.bf16.mxu1 %v539_v52  ;;  %v51_v52 = vld [vmem:[#allocation2 + $0x58] sm:$0xff]  ;;  %v88_v3 = vld [vmem:[#allocation2 + $0x180] sm:$0xff]  ;;  %v93_v9 = vld [vmem:[#allocation2 + $0x1a8] sm:$0xff] }
  0x48   :  { %v60_v10 = vld [vmem:[#allocation2 + $0xa0] sm:$0xff]  ;;  %v62_v14 = vld [vmem:[#allocation2 + $0xb0] sm:$0xff]  ;;  %v65_v16 = vld [vmem:[#allocation2 + $0xc8] sm:$0xff] }
  0x49   :  { %v94_v15 = vld [vmem:[#allocation2 + $0x1b0] sm:$0xff]  ;;  %v96_v19 = vld [vmem:[#allocation2 + $0x1c0] sm:$0xff]  ;;  %v67_v20 = vld [vmem:[#allocation2 + $0xd8] sm:$0xff] }
  0x4a   :  { %542 = vmatpush1.bf16.msra.mxu0 %v541_v57  ;;  %595 = vmatpush1.bf16.msra.mxu1 %v541_v57  ;;  %v85_v57 = vld [vmem:[#allocation2 + $0x168] sm:$0xff]  ;;  %v99_v21 = vld [vmem:[#allocation2 + $0x1d8] sm:$0xff]  ;;  %v66_v22 = vld [vmem:[#allocation2 + $0xd0] sm:$0xff] }
  0x4b   :  { %544 = vmatprep.subr.bf16.mxu0 %v543_v58  ;;  %580 = vmatprep.subr.bf16.mxu1 %v543_v58  ;;  %v52_v58 = vld [vmem:[#allocation2 + $0x60] sm:$0xff]  ;;  %v101_v25 = vld [vmem:[#allocation2 + $0x1e8] sm:$0xff]  ;;  %v71_v28 = vld [vmem:[#allocation2 + $0xf8] sm:$0xff] }
  0x4c   :  { %v68_v26 = vld [vmem:[#allocation2 + $0xe0] sm:$0xff]  ;;  %v102_v31 = vld [vmem:[#allocation2 + $0x1f0] sm:$0xff] }
  0x4d   :  { %v100_v27 = vld [vmem:[#allocation2 + $0x1e0] sm:$0xff] }
  0x4e   :  { %546 = vmatpush1.bf16.msra.mxu0 %v545_v63  ;;  %596 = vmatpush1.bf16.msra.mxu1 %v545_v63  ;;  %v86_v63 = vld [vmem:[#allocation2 + $0x170] sm:$0xff] }
  0x4f   :  { %548 = vmatprep.subr.bf16.mxu0 %v547_v0  ;;  %581 = vmatprep.subr.bf16.mxu1 %v547_v0  ;;  %v57_v0 = vld [vmem:[#allocation2 + $0x88] sm:$0xff] }
  0x52   :  { %550 = vmatpush1.bf16.msra.mxu0 %v549_v5  ;;  %597 = vmatpush1.bf16.msra.mxu1 %v549_v5  ;;  %v91_v5 = vld [vmem:[#allocation2 + $0x198] sm:$0xff] }
  0x53   :  { %552 = vmatprep.subr.bf16.mxu0 %v551_v6  ;;  %582 = vmatprep.subr.bf16.mxu1 %v551_v6  ;;  %v58_v6 = vld [vmem:[#allocation2 + $0x90] sm:$0xff] }
  0x56   :  { %554 = vmatpush1.bf16.msra.mxu0 %v553_v11  ;;  %598 = vmatpush1.bf16.msra.mxu1 %v553_v11  ;;  %v92_v11 = vld [vmem:[#allocation2 + $0x1a0] sm:$0xff] }
  0x57   :  { %556 = vmatprep.subr.bf16.mxu0 %v555_v12  ;;  %583 = vmatprep.subr.bf16.mxu1 %v555_v12  ;;  %v63_v12 = vld [vmem:[#allocation2 + $0xb8] sm:$0xff] }
  0x5a   :  { %558 = vmatpush1.bf16.msra.mxu0 %v557_v17  ;;  %599 = vmatpush1.bf16.msra.mxu1 %v557_v17  ;;  %v97_v17 = vld [vmem:[#allocation2 + $0x1c8] sm:$0xff] }
  0x5b   :  { %560 = vmatprep.subr.bf16.mxu0 %v559_v18  ;;  %584 = vmatprep.subr.bf16.mxu1 %v559_v18  ;;  %v64_v18 = vld [vmem:[#allocation2 + $0xc0] sm:$0xff] }
  0x5e   :  { %562 = vmatpush1.bf16.msra.mxu0 %v561_v23  ;;  %600 = vmatpush1.bf16.msra.mxu1 %v561_v23  ;;  %v98_v23 = vld [vmem:[#allocation2 + $0x1d0] sm:$0xff] }
  0x5f   :  { %564 = vmatprep.subr.bf16.mxu0 %v563_v24  ;;  %585 = vmatprep.subr.bf16.mxu1 %v563_v24  ;;  %v69_v24 = vld [vmem:[#allocation2 + $0xe8] sm:$0xff] }
  0x62   :  { %566 = vmatpush1.bf16.msra.mxu0 %v565_v29  ;;  %601 = vmatpush1.bf16.msra.mxu1 %v565_v29  ;;  %v103_v29 = vld [vmem:[#allocation2 + $0x1f8] sm:$0xff] }
  0x63   :  { %568 = vmatprep.subr.bf16.mxu0 %v567_v30  ;;  %586 = vmatprep.subr.bf16.mxu1 %v567_v30  ;;  %v70_v30 = vld [vmem:[#allocation2 + $0xf0] sm:$0xff] }
  0x66   :  { %570 = vmatpush1.bf16.msra.mxu0 %v569_v33  ;;  %602 = vmatpush1.bf16.msra.mxu1 %v569_v33 }
  0x69   :  { %233 = vmatmul.mubr.f32.vlgmr.msra.gmra.mrb[0].mxu0 %v40_v34  ;;  %329 = vmatmul.mubr.f32.vlgmr.msra.gmra.mrb[0].mxu1 %v72_v35 }
  0x6a   :  { %238 = vmatprep.mubr.f32.mxu0 %v43_v36  ;;  %334 = vmatprep.mubr.f32.mxu1 %v75_v37 }
  0x6d   :  { %239 = vmatmul.mubr.f32.gmra.mrb[2].mxu0 %v42_v38  ;;  %335 = vmatmul.mubr.f32.gmra.mrb[2].mxu1 %v74_v39 }
  0x6e   :  { %244 = vmatprep.mubr.f32.mxu0 %v45_v40  ;;  %340 = vmatprep.mubr.f32.mxu1 %v77_v41 }
  0x71   :  { %245 = vmatmul.mubr.f32.gmra.mrb[4].mxu0 %v44_v42  ;;  %341 = vmatmul.mubr.f32.gmra.mrb[4].mxu1 %v76_v43 }
  0x72   :  { %250 = vmatprep.mubr.f32.mxu0 %v47_v44  ;;  %346 = vmatprep.mubr.f32.mxu1 %v79_v45 }
  0x75   :  { %251 = vmatmul.mubr.f32.gmra.mrb[6].mxu0 %v46_v46  ;;  %347 = vmatmul.mubr.f32.gmra.mrb[6].mxu1 %v78_v47 }
  0x76   :  { %256 = vmatprep.mubr.f32.mxu0 %v49_v48  ;;  %352 = vmatprep.mubr.f32.mxu1 %v81_v49 }
  0x79   :  { %257 = vmatmul.mubr.f32.gmra.mrb[8].mxu0 %v48_v50  ;;  %353 = vmatmul.mubr.f32.gmra.mrb[8].mxu1 %v80_v51 }
  0x7a   :  { %262 = vmatprep.mubr.f32.mxu0 %v51_v52  ;;  %358 = vmatprep.mubr.f32.mxu1 %v83_v53 }
  0x7d   :  { %263 = vmatmul.mubr.f32.gmra.mrb[10].mxu0 %v50_v54  ;;  %359 = vmatmul.mubr.f32.gmra.mrb[10].mxu1 %v82_v55 }
  0x7e   :  { %268 = vmatprep.mubr.f32.mxu0 %v53_v56  ;;  %364 = vmatprep.mubr.f32.mxu1 %v85_v57 }
  0x81   :  { %269 = vmatmul.mubr.f32.gmra.mrb[12].mxu0 %v52_v58  ;;  %365 = vmatmul.mubr.f32.gmra.mrb[12].mxu1 %v84_v59 }
  0x82   :  { %274 = vmatprep.mubr.f32.mxu0 %v55_v60  ;;  %370 = vmatprep.mubr.f32.mxu1 %v87_v61 }
  0x85   :  { %275 = vmatmul.mubr.f32.gmra.mrb[14].mxu0 %v54_v62  ;;  %371 = vmatmul.mubr.f32.gmra.mrb[14].mxu1 %v86_v63 }
  0x86   :  { %280 = vmatprep.mubr.f32.mxu0 %v57_v0  ;;  %376 = vmatprep.mubr.f32.mxu1 %v89_v1 }
  0x89   :  { %281 = vmatmul.mubr.f32.gmra.mrb[16].mxu0 %v56_v2  ;;  %377 = vmatmul.mubr.f32.gmra.mrb[16].mxu1 %v88_v3 }
  0x8a   :  { %286 = vmatprep.mubr.f32.mxu0 %v59_v4  ;;  %382 = vmatprep.mubr.f32.mxu1 %v91_v5 }
  0x8d   :  { %287 = vmatmul.mubr.f32.gmra.mrb[18].mxu0 %v58_v6  ;;  %383 = vmatmul.mubr.f32.gmra.mrb[18].mxu1 %v90_v7 }
  0x8e   :  { %292 = vmatprep.mubr.f32.mxu0 %v61_v8  ;;  %388 = vmatprep.mubr.f32.mxu1 %v93_v9 }
  0x91   :  { %293 = vmatmul.mubr.f32.gmra.mrb[20].mxu0 %v60_v10  ;;  %389 = vmatmul.mubr.f32.gmra.mrb[20].mxu1 %v92_v11 }
  0x92   :  { %298 = vmatprep.mubr.f32.mxu0 %v63_v12  ;;  %394 = vmatprep.mubr.f32.mxu1 %v95_v13 }
  0x95   :  { %299 = vmatmul.mubr.f32.gmra.mrb[22].mxu0 %v62_v14  ;;  %395 = vmatmul.mubr.f32.gmra.mrb[22].mxu1 %v94_v15 }
  0x96   :  { %304 = vmatprep.mubr.f32.mxu0 %v65_v16  ;;  %400 = vmatprep.mubr.f32.mxu1 %v97_v17 }
  0x99   :  { %305 = vmatmul.mubr.f32.gmra.mrb[24].mxu0 %v64_v18  ;;  %401 = vmatmul.mubr.f32.gmra.mrb[24].mxu1 %v96_v19 }
  0x9a   :  { %310 = vmatprep.mubr.f32.mxu0 %v67_v20  ;;  %406 = vmatprep.mubr.f32.mxu1 %v99_v21 }
  0x9d   :  { %311 = vmatmul.mubr.f32.gmra.mrb[26].mxu0 %v66_v22  ;;  %407 = vmatmul.mubr.f32.gmra.mrb[26].mxu1 %v98_v23 }
  0x9e   :  { %316 = vmatprep.mubr.f32.mxu0 %v69_v24  ;;  %412 = vmatprep.mubr.f32.mxu1 %v101_v25 }
  0xa1   :  { %317 = vmatmul.mubr.f32.gmra.mrb[28].mxu0 %v68_v26  ;;  %413 = vmatmul.mubr.f32.gmra.mrb[28].mxu1 %v100_v27 }
  0xa2   :  { %322 = vmatprep.mubr.f32.mxu0 %v71_v28  ;;  %418 = vmatprep.mubr.f32.mxu1 %v103_v29 }
  0xa5   :  { %323 = vmatmul.mubr.f32.gmra.mrb[30].mxu0 %v70_v30  ;;  %419 = vmatmul.mubr.f32.gmra.mrb[30].mxu1 %v102_v31 }
 0x13c   :  { %v234_v32 = vpop.f32.mrb[0].mxu0  ;;  %v330_v33 = vpop.f32.mrb[0].mxu1 }
 0x13d   :  { %425 = vst [vmem:[#allocation7] sm:$0xff] %v234_v32  ;;  %457 = vst [vmem:[#allocation7 + $0x100] sm:$0xff] %v330_v33  ;;  %v236_v34 = vpop.f32.mrb[1].mxu0  ;;  %v332_v35 = vpop.f32.mrb[1].mxu1 }
 0x13e   :  { %426 = vst [vmem:[#allocation7 + $0x8] sm:$0xff] %v236_v34  ;;  %458 = vst [vmem:[#allocation7 + $0x108] sm:$0xff] %v332_v35 }
 0x140   :  { %v240_v36 = vpop.f32.mrb[2].mxu0  ;;  %v336_v37 = vpop.f32.mrb[2].mxu1 }
 0x141   :  { %427 = vst [vmem:[#allocation7 + $0x10] sm:$0xff] %v240_v36  ;;  %459 = vst [vmem:[#allocation7 + $0x110] sm:$0xff] %v336_v37  ;;  %v242_v38 = vpop.f32.mrb[3].mxu0  ;;  %v338_v39 = vpop.f32.mrb[3].mxu1 }
 0x142   :  { %428 = vst [vmem:[#allocation7 + $0x18] sm:$0xff] %v242_v38  ;;  %460 = vst [vmem:[#allocation7 + $0x118] sm:$0xff] %v338_v39 }
 0x144   :  { %v246_v40 = vpop.f32.mrb[4].mxu0  ;;  %v342_v41 = vpop.f32.mrb[4].mxu1 }
 0x145   :  { %429 = vst [vmem:[#allocation7 + $0x20] sm:$0xff] %v246_v40  ;;  %461 = vst [vmem:[#allocation7 + $0x120] sm:$0xff] %v342_v41  ;;  %v248_v42 = vpop.f32.mrb[5].mxu0  ;;  %v344_v43 = vpop.f32.mrb[5].mxu1 }
 0x146   :  { %430 = vst [vmem:[#allocation7 + $0x28] sm:$0xff] %v248_v42  ;;  %462 = vst [vmem:[#allocation7 + $0x128] sm:$0xff] %v344_v43 }
 0x148   :  { %v252_v44 = vpop.f32.mrb[6].mxu0  ;;  %v348_v45 = vpop.f32.mrb[6].mxu1 }
 0x149   :  { %431 = vst [vmem:[#allocation7 + $0x30] sm:$0xff] %v252_v44  ;;  %463 = vst [vmem:[#allocation7 + $0x130] sm:$0xff] %v348_v45  ;;  %v254_v46 = vpop.f32.mrb[7].mxu0  ;;  %v350_v47 = vpop.f32.mrb[7].mxu1 }
 0x14a   :  { %432 = vst [vmem:[#allocation7 + $0x38] sm:$0xff] %v254_v46  ;;  %464 = vst [vmem:[#allocation7 + $0x138] sm:$0xff] %v350_v47 }
 0x14c   :  { %v258_v48 = vpop.f32.mrb[8].mxu0  ;;  %v354_v49 = vpop.f32.mrb[8].mxu1 }
 0x14d   :  { %433 = vst [vmem:[#allocation7 + $0x40] sm:$0xff] %v258_v48  ;;  %465 = vst [vmem:[#allocation7 + $0x140] sm:$0xff] %v354_v49  ;;  %v260_v50 = vpop.f32.mrb[9].mxu0  ;;  %v356_v51 = vpop.f32.mrb[9].mxu1 }
 0x14e   :  { %434 = vst [vmem:[#allocation7 + $0x48] sm:$0xff] %v260_v50  ;;  %466 = vst [vmem:[#allocation7 + $0x148] sm:$0xff] %v356_v51 }
 0x150   :  { %v264_v52 = vpop.f32.mrb[10].mxu0  ;;  %v360_v53 = vpop.f32.mrb[10].mxu1 }
 0x151   :  { %435 = vst [vmem:[#allocation7 + $0x50] sm:$0xff] %v264_v52  ;;  %467 = vst [vmem:[#allocation7 + $0x150] sm:$0xff] %v360_v53  ;;  %v266_v54 = vpop.f32.mrb[11].mxu0  ;;  %v362_v55 = vpop.f32.mrb[11].mxu1 }
 0x152   :  { %436 = vst [vmem:[#allocation7 + $0x58] sm:$0xff] %v266_v54  ;;  %468 = vst [vmem:[#allocation7 + $0x158] sm:$0xff] %v362_v55 }
 0x154   :  { %v270_v56 = vpop.f32.mrb[12].mxu0  ;;  %v366_v57 = vpop.f32.mrb[12].mxu1 }
 0x155   :  { %437 = vst [vmem:[#allocation7 + $0x60] sm:$0xff] %v270_v56  ;;  %469 = vst [vmem:[#allocation7 + $0x160] sm:$0xff] %v366_v57  ;;  %v272_v58 = vpop.f32.mrb[13].mxu0  ;;  %v368_v59 = vpop.f32.mrb[13].mxu1 }
 0x156   :  { %438 = vst [vmem:[#allocation7 + $0x68] sm:$0xff] %v272_v58  ;;  %470 = vst [vmem:[#allocation7 + $0x168] sm:$0xff] %v368_v59 }
 0x158   :  { %v276_v60 = vpop.f32.mrb[14].mxu0  ;;  %v372_v61 = vpop.f32.mrb[14].mxu1 }
 0x159   :  { %439 = vst [vmem:[#allocation7 + $0x70] sm:$0xff] %v276_v60  ;;  %471 = vst [vmem:[#allocation7 + $0x170] sm:$0xff] %v372_v61  ;;  %v278_v62 = vpop.f32.mrb[15].mxu0  ;;  %v374_v63 = vpop.f32.mrb[15].mxu1 }
 0x15a   :  { %440 = vst [vmem:[#allocation7 + $0x78] sm:$0xff] %v278_v62  ;;  %472 = vst [vmem:[#allocation7 + $0x178] sm:$0xff] %v374_v63 }
 0x15c   :  { %v282_v0 = vpop.f32.mrb[16].mxu0  ;;  %v378_v1 = vpop.f32.mrb[16].mxu1 }
 0x15d   :  { %441 = vst [vmem:[#allocation7 + $0x80] sm:$0xff] %v282_v0  ;;  %473 = vst [vmem:[#allocation7 + $0x180] sm:$0xff] %v378_v1  ;;  %v284_v2 = vpop.f32.mrb[17].mxu0  ;;  %v380_v3 = vpop.f32.mrb[17].mxu1 }
 0x15e   :  { %442 = vst [vmem:[#allocation7 + $0x88] sm:$0xff] %v284_v2  ;;  %474 = vst [vmem:[#allocation7 + $0x188] sm:$0xff] %v380_v3 }
 0x160   :  { %v288_v4 = vpop.f32.mrb[18].mxu0  ;;  %v384_v5 = vpop.f32.mrb[18].mxu1 }
 0x161   :  { %443 = vst [vmem:[#allocation7 + $0x90] sm:$0xff] %v288_v4  ;;  %475 = vst [vmem:[#allocation7 + $0x190] sm:$0xff] %v384_v5  ;;  %v290_v6 = vpop.f32.mrb[19].mxu0  ;;  %v386_v7 = vpop.f32.mrb[19].mxu1 }
 0x162   :  { %444 = vst [vmem:[#allocation7 + $0x98] sm:$0xff] %v290_v6  ;;  %476 = vst [vmem:[#allocation7 + $0x198] sm:$0xff] %v386_v7 }
 0x164   :  { %v294_v8 = vpop.f32.mrb[20].mxu0  ;;  %v390_v9 = vpop.f32.mrb[20].mxu1 }
 0x165   :  { %445 = vst [vmem:[#allocation7 + $0xa0] sm:$0xff] %v294_v8  ;;  %477 = vst [vmem:[#allocation7 + $0x1a0] sm:$0xff] %v390_v9  ;;  %v296_v10 = vpop.f32.mrb[21].mxu0  ;;  %v392_v11 = vpop.f32.mrb[21].mxu1 }
 0x166   :  { %446 = vst [vmem:[#allocation7 + $0xa8] sm:$0xff] %v296_v10  ;;  %478 = vst [vmem:[#allocation7 + $0x1a8] sm:$0xff] %v392_v11 }
 0x168   :  { %v300_v12 = vpop.f32.mrb[22].mxu0  ;;  %v396_v13 = vpop.f32.mrb[22].mxu1 }
 0x169   :  { %447 = vst [vmem:[#allocation7 + $0xb0] sm:$0xff] %v300_v12  ;;  %479 = vst [vmem:[#allocation7 + $0x1b0] sm:$0xff] %v396_v13  ;;  %v302_v14 = vpop.f32.mrb[23].mxu0  ;;  %v398_v15 = vpop.f32.mrb[23].mxu1 }
 0x16a   :  { %448 = vst [vmem:[#allocation7 + $0xb8] sm:$0xff] %v302_v14  ;;  %480 = vst [vmem:[#allocation7 + $0x1b8] sm:$0xff] %v398_v15 }
 0x16c   :  { %v306_v16 = vpop.f32.mrb[24].mxu0  ;;  %v402_v17 = vpop.f32.mrb[24].mxu1 }
 0x16d   :  { %449 = vst [vmem:[#allocation7 + $0xc0] sm:$0xff] %v306_v16  ;;  %481 = vst [vmem:[#allocation7 + $0x1c0] sm:$0xff] %v402_v17  ;;  %v308_v18 = vpop.f32.mrb[25].mxu0  ;;  %v404_v19 = vpop.f32.mrb[25].mxu1 }
 0x16e   :  { %450 = vst [vmem:[#allocation7 + $0xc8] sm:$0xff] %v308_v18  ;;  %482 = vst [vmem:[#allocation7 + $0x1c8] sm:$0xff] %v404_v19 }
 0x170   :  { %v312_v20 = vpop.f32.mrb[26].mxu0  ;;  %v408_v21 = vpop.f32.mrb[26].mxu1 }
 0x171   :  { %451 = vst [vmem:[#allocation7 + $0xd0] sm:$0xff] %v312_v20  ;;  %483 = vst [vmem:[#allocation7 + $0x1d0] sm:$0xff] %v408_v21  ;;  %v314_v22 = vpop.f32.mrb[27].mxu0  ;;  %v410_v23 = vpop.f32.mrb[27].mxu1 }
 0x172   :  { %452 = vst [vmem:[#allocation7 + $0xd8] sm:$0xff] %v314_v22  ;;  %484 = vst [vmem:[#allocation7 + $0x1d8] sm:$0xff] %v410_v23 }
 0x174   :  { %v318_v24 = vpop.f32.mrb[28].mxu0  ;;  %v414_v25 = vpop.f32.mrb[28].mxu1 }
 0x175   :  { %453 = vst [vmem:[#allocation7 + $0xe0] sm:$0xff] %v318_v24  ;;  %485 = vst [vmem:[#allocation7 + $0x1e0] sm:$0xff] %v414_v25  ;;  %v320_v26 = vpop.f32.mrb[29].mxu0  ;;  %v416_v27 = vpop.f32.mrb[29].mxu1 }
 0x176   :  { %454 = vst [vmem:[#allocation7 + $0xe8] sm:$0xff] %v320_v26  ;;  %486 = vst [vmem:[#allocation7 + $0x1e8] sm:$0xff] %v416_v27 }
 0x178   :  { %v324_v28 = vpop.f32.mrb[30].mxu0  ;;  %v420_v29 = vpop.f32.mrb[30].mxu1 }
 0x179   :  { %455 = vst [vmem:[#allocation7 + $0xf0] sm:$0xff] %v324_v28  ;;  %487 = vst [vmem:[#allocation7 + $0x1f0] sm:$0xff] %v420_v29  ;;  %v326_v30 = vpop.f32.mrb[31].mxu0  ;;  %v422_v31 = vpop.f32.mrb[31].mxu1 }
 0x17a   :  { %456 = vst [vmem:[#allocation7 + $0xf8] sm:$0xff] %v326_v30  ;;  %488 = vst [vmem:[#allocation7 + $0x1f8] sm:$0xff] %v422_v31 }
 0x17b   :  { %663 = shalt.err (!%p660_p6)
}
 0x17c   :  { %s664_s10 = scalar_lea.hbm %s747_s2, 8192 }
 0x17d   :  { %p665_p7 = scmp.ne.s32.totalorder %s747_s2, %s664_s10  ;;  %p668_p8 = scmp.lt.u32.totalorder %s664_s10, %s747_s2 }
 0x17f   :  { %p670_p9 = pnand %p668_p8, %p665_p7 }
 0x181   :  { %673 = shalt.err (!%p670_p9)
}
 0x182   :  { %500 = dma.vmem_to_hbm [thread:$0]  %s495_s6, 8192, %s747_s2, [#allocation4], %s681_s19, %s681_s19, %s682_s20  }
 0x183   :  { %678 = dma.done.wait [#allocation4], 8192  }
 0x184   :  { %679 = vsyncadd [#allocation4], 4294959104 }
 0x185   :  { %504 = vsyncpa [#allocation3], 1 }
 0x186   :  { %505 = vsyncpa [#allocation6], 1 }
 0x187   :  { %506 = vsyncpa [#allocation4], 1 }

</bundles_post_ra>
